<compile_context>
chip_gen: v7x
topology: tpu7x:2x2x1
jax: 0.10.0
libtpu: 0.0.40
codegen_flags: <defaults>
</compile_context>

<pallas_src>
import jax
import jax.numpy as jnp
from jax.experimental import pallas as pl
from jax.experimental.pallas import tpu as pltpu


_VMEM_LIMIT_BYTES = 32 * 1024 * 1024  # <= v7x default scoped VMEM, << v5e/v6e physical


def _round_up(x: int, m: int) -> int:
    return ((x + m - 1) // m) * m


def _cdiv(a: int, b: int) -> int:
    return -(-a // b)


# -----------------------------------------------------------------------------
# Kernels
# -----------------------------------------------------------------------------
def _stl_kernel_fused(x_ref, w_ref, o_ref):
    """Full-depth row tile: o = x_tile @ w.  w is VMEM-resident (one DMA total)."""
    o_ref[...] = jnp.dot(
        x_ref[...], w_ref[...], preferred_element_type=jnp.float32
    ).astype(o_ref.dtype)


def _stl_kernel_ktiled(x_ref, w_ref, o_ref):
    """K-tiled fallback (very large d): accumulate directly into the resident
    f32 output block -- no scratch accumulator, no epilogue cast."""
    k = pl.program_id(1)

    @pl.when(k == 0)
    def _():
        o_ref[...] = jnp.zeros_like(o_ref)

    o_ref[...] += jnp.dot(
        x_ref[...], w_ref[...], preferred_element_type=jnp.float32
    )


# -----------------------------------------------------------------------------
# Tiling helpers
# -----------------------------------------------------------------------------
def _row_tiling(N: int, tm_cap: int):
    """Pick a row tile.  Prefer no padding (tm == N, or a clean multiple-of-8
    divisor of N); otherwise balanced tiles so N just above a boundary doesn't
    double the padded row count."""
    if N <= tm_cap:
        return N, 0                      # single full-dim tile, no padding
    hi = (min(tm_cap, N) // 8) * 8
    for cand in range(hi, 63, -8):       # clean divisor -> no pad copy of x
        if N % cand == 0:
            return cand, 0
    n_tiles = _cdiv(N, tm_cap)
    tm = _round_up(_cdiv(N, n_tiles), 8)
    return tm, _round_up(N, tm) - N


# -----------------------------------------------------------------------------
# Wrapper (== STL_CE.forward): pred = x @ w, returned as float32
# -----------------------------------------------------------------------------
def stl_ce_forward(x: jax.Array, w: jax.Array, *, impl=None,
                   max_block_bytes: int = 8 * 1024 * 1024,
                   cast_to_bf16: bool = False) -> jax.Array:
    """x: (N, d) activations; w: (d, T) parameter; returns (N, T) float32."""
    N, d = x.shape
    d2, T = w.shape
    assert d == d2, "feature dims must match"

    if cast_to_bf16:
        # Bandwidth-bound deployments: both operands in bf16, accumulate in f32.
        x = x.astype(jnp.bfloat16)
        w = w.astype(jnp.bfloat16)

    if impl is None:
        # Small-problem bypass: for tiny shapes the pallas_call launch, layout
        # plumbing and (tm, T) masked stores dominate; XLA matmul is faster.
        impl = "xla" if N * d * max(T, 1) <= 128 * 128 else "pallas"

    if impl == "xla":
        return jnp.dot(x, w, preferred_element_type=jnp.float32)

    itemsize = jnp.dtype(x.dtype).itemsize
    w_bytes = d * T * jnp.dtype(w.dtype).itemsize

    # Common case: full feature depth per row tile, w fully resident in VMEM.
    fused_ok = (2 * 8 * d * itemsize <= max_block_bytes) and (w_bytes <= 4 * 1024 * 1024)

    if fused_ok:
        tm_cap = min(1024, max(8, (max_block_bytes // (2 * d * itemsize)) // 8 * 8))
        tm, n_pad_rows = _row_tiling(N, tm_cap)
        N_used = N + n_pad_rows
        x_in = x if n_pad_rows == 0 else jnp.pad(x, ((0, n_pad_rows), (0, 0)))

        out = pl.pallas_call(
            _stl_kernel_fused,
            out_shape=jax.ShapeDtypeStruct((N_used, T), jnp.float32),
            grid_spec=pltpu.PrefetchScalarGridSpec(
                num_scalar_prefetch=0,
                grid=(N_used // tm,),
                in_specs=[
                    pl.BlockSpec((tm, d), lambda i: (i, 0)),
                    pl.BlockSpec((d, T), lambda i: (0, 0)),   # resident: DMA'd once
                ],
                out_specs=pl.BlockSpec((tm, T), lambda i: (i, 0)),
            ),
            compiler_params=pltpu.CompilerParams(
                dimension_semantics=("parallel",),
                vmem_limit_bytes=_VMEM_LIMIT_BYTES,
            ),
        )(x_in, w)
    else:
        # Rare huge-d fallback: tile the contraction axis, accumulate into o_ref.
        d_pad = _round_up(d, 128)
        tk = 128
        for cand in (512, 256, 128):
            if d_pad % cand == 0 and 2 * 8 * cand * itemsize <= max_block_bytes:
                tk = cand
                break
        tm_cap = min(1024, max(8, (max_block_bytes // (2 * tk * itemsize)) // 8 * 8))
        tm, n_pad_rows = _row_tiling(N, tm_cap)
        N_used = N + n_pad_rows

        if n_pad_rows or d_pad != d:
            x_in = jnp.pad(x, ((0, n_pad_rows), (0, d_pad - d)))
        else:
            x_in = x
        w_in = jnp.pad(w, ((0, d_pad - d), (0, 0))) if d_pad != d else w

        out = pl.pallas_call(
            _stl_kernel_ktiled,
            out_shape=jax.ShapeDtypeStruct((N_used, T), jnp.float32),
            grid_spec=pltpu.PrefetchScalarGridSpec(
                num_scalar_prefetch=0,
                grid=(N_used // tm, d_pad // tk),
                in_specs=[
                    pl.BlockSpec((tm, tk), lambda i, k: (i, k)),
                    pl.BlockSpec((tk, T), lambda i, k: (k, 0)),
                ],
                out_specs=pl.BlockSpec((tm, T), lambda i, k: (i, 0)),
            ),
            compiler_params=pltpu.CompilerParams(
                dimension_semantics=("parallel", "arbitrary"),
                vmem_limit_bytes=_VMEM_LIMIT_BYTES,
            ),
        )(x_in, w_in)

    return out if N_used == N else out[:N, :]


if __name__ == "__main__":
    key = jax.random.PRNGKey(0)
    k_xs, k_ws, k_xl, k_wl = jax.random.split(key, 4)

    # (1) The module's literal shape: N=8 instances, d=32 features, T=1 task.
    #     Auto path -> XLA bypass (Pallas overhead would dominate at this size).
    N_s, d_s, T_s = 8, 32, 1
    w_s = jax.random.normal(k_ws, (d_s, T_s), dtype=jnp.float32)
    x_s = jax.random.normal(k_xs, (N_s, d_s), dtype=jnp.float32)
    pred_s = stl_ce_forward(x_s, w_s)
    jax.block_until_ready(pred_s)
    ref_s = jnp.matmul(x_s, w_s, precision=jax.lax.Precision.HIGHEST)
    assert pred_s.shape == (N_s, T_s) and pred_s.dtype == jnp.float32
    assert jnp.allclose(pred_s, ref_s, rtol=1e-2, atol=1e-2)

    # (2) Pallas path (collapsed-k, w resident in VMEM, unpadded (N, T) output).
    N_l, d_l, T_l = 512, 256, 1
    w_l = jax.random.normal(k_wl, (d_l, T_l), dtype=jnp.float32)
    x_l = jax.random.normal(k_xl, (N_l, d_l), dtype=jnp.float32)
    pred_l = stl_ce_forward(x_l, w_l, impl="pallas")
    jax.block_until_ready(pred_l)
    ref_l = jnp.matmul(x_l, w_l, precision=jax.lax.Precision.HIGHEST)
    assert pred_l.shape == (N_l, T_l) and pred_l.dtype == jnp.float32
    assert jnp.allclose(pred_l, ref_l, rtol=1e-2, atol=1e-2)

    # (3) Force the k-tiled fallback (direct accumulation into o_ref) by
    #     shrinking the per-block VMEM budget; verifies that path on hardware.
    pred_k = stl_ce_forward(x_l, w_l, impl="pallas", max_block_bytes=8 * 1024)
    jax.block_until_ready(pred_k)
    assert pred_k.shape == (N_l, T_l) and pred_k.dtype == jnp.float32
    assert jnp.allclose(pred_k, ref_l, rtol=1e-2, atol=1e-2)

    print("KERNEL_OK")
</pallas_src>

<mosaic_0001>
module attributes {stable_mosaic.version = 11 : i64} {
  func.func @_stl_kernel_fused(%arg0: i32, %arg1: memref<512x256xf32, #tpu.memory_space<vmem>>, %arg2: memref<256x1xf32, #tpu.memory_space<vmem>>, %arg3: memref<512x1xf32, #tpu.memory_space<vmem>>) attributes {dimension_semantics = [#tpu.dimension_semantics<parallel>], iteration_bounds = array<i64: 1>, scalar_prefetch = 0 : i64, scratch_operands = 0 : i64, tpu.core_type = #tpu.core_type<tc>, window_params = [{transform_indices = @transform_0, window_bounds = array<i64: 512, 256>}, {pipeline_mode = #tpu.pipeline_mode<synchronous>, transform_indices = @transform_1, window_bounds = array<i64: 256, 1>}, {transform_indices = @transform_2, window_bounds = array<i64: 512, 1>}]} {
    %c0 = arith.constant 0 : index
    %c0_0 = arith.constant 0 : index
    %0 = vector.load %arg1[%c0, %c0_0] : memref<512x256xf32, #tpu.memory_space<vmem>>, vector<512x256xf32>
    %c0_1 = arith.constant 0 : index
    %c0_2 = arith.constant 0 : index
    %1 = vector.load %arg2[%c0_1, %c0_2] : memref<256x1xf32, #tpu.memory_space<vmem>>, vector<256x1xf32>
    %cst = arith.constant dense<0.000000e+00> : vector<512x1xf32>
    %2 = tpu.matmul %0, %1, %cst {dimension_numbers = #tpu.dot_dimension_numbers<[1], [0], [0], [1], [0, 0, 1, 1], [], []>} : vector<512x256xf32>, vector<256x1xf32>, vector<512x1xf32> -> vector<512x1xf32>
    %c0_3 = arith.constant 0 : index
    %c0_4 = arith.constant 0 : index
    %3 = vector.load %arg3[%c0_3, %c0_4] : memref<512x1xf32, #tpu.memory_space<vmem>>, vector<512x1xf32>
    tpu.vector_store %arg3[%c0_3, %c0_4], %2 {strides = array<i32>} : memref<512x1xf32, #tpu.memory_space<vmem>>, vector<512x1xf32>,
    return
  }
  func.func @transform_0(%arg0: i32) -> (i32, i32) {
    %c0_i32 = arith.constant 0 : i32
    %c0_i32_0 = arith.constant 0 : i32
    return %arg0, %c0_i32 : i32, i32
  }
  func.func @transform_1(%arg0: i32) -> (i32, i32) {
    %c0_i32 = arith.constant 0 : i32
    %c0_i32_0 = arith.constant 0 : i32
    %c0_i32_1 = arith.constant 0 : i32
    return %c0_i32, %c0_i32_0 : i32, i32
  }
  func.func @transform_2(%arg0: i32) -> (i32, i32) {
    %c0_i32 = arith.constant 0 : i32
    %c0_i32_0 = arith.constant 0 : i32
    return %arg0, %c0_i32 : i32, i32
  }
}

</mosaic_0001>

<bundles_post_ra>
// kernel: tpu_custom_call.1
= control target key start
LH: loop header
LB: loop body
LE: loop exit
PB: predicated region body
PF: predicated region fallthrough
CT: control target
= control target key end

     0   :  { %7 = vsyncpa [#allocation3], 0  ;;  %s748_s9 = smov [#allocation2]   ;;  %s1163_s0 = inlined_call_operand.hbm [shape: f32[512,256], index: 0, kind: input, shape index: {}]   ;;  %s1164_s1 = inlined_call_operand.vmem [shape: f32[256,1], index: 1, kind: input, shape index: {}]   ;;  %s1165_s2 = inlined_call_operand.vmem [shape: f32[512,1], index: 2, kind: output, shape index: {}]  }
   0x1   :  { %s13_s10 = sshll.u32 %s748_s9, 4  ;;  %s724_s13 = scalar_lea.hbm %s1163_s0, 16384  ;;  %s14_s10 = int_to_ptr.vmem [resolvable:$true] %s13_s10 }
   0x2   :  { %p725_p0 = scmp.ne.s32.totalorder %s1163_s0, %s724_s13  ;;  %p728_p1 = scmp.lt.u32.totalorder %s724_s13, %s1163_s0 }
   0x4   :  { %p730_p2 = pnand %p728_p1, %p725_p0 }
   0x6   :  { %733 = shalt.err (!%p730_p2)
}
   0x7   :  { %s734_s18 = scalar_lea.vmem %s14_s10, 16384  ;;  %p739_p4 = scmp.lt.s32.totalorder %s14_s10, %s14_s10 }
   0x8   :  { %p735_p3 = scmp.ne.s32.totalorder %s14_s10, %s734_s18  ;;  %p740_p5 = scmp.lt.s32.totalorder %s734_s18, %s734_s18 }
   0xa   :  { %p741_p6 = por %p740_p5, %p739_p4 }
   0xc   :  { %p742_p7 = pnand %p741_p6, %p735_p3 }
   0xe   :  { %745 = shalt.err (!%p742_p7)
}
   0xf   :  { %s749_s19 = smov 256   ;;  %s750_s20 = smov 16  }
  0x10   :  { %19 = dma.hbm_to_vmem [thread:$0]  %s1163_s0, 16384, %s14_s10, [#allocation3], %s749_s19, %s749_s19, %s750_s20  }
  0x11   :  { %746 = dma.done.wait [#allocation3], 16384  }
  0x12   :  { %747 = vsyncadd [#allocation3], 4294950912  ;;  %v751_v0 = vmov 0.0|0.0   ;;  %v153_v1 = vld [vmem:[%s1164_s1] sm:$0xff]  ;;  %v154_v2 = vld [vmem:[%s1164_s1 + $0x8] sm:$0xff]  ;;  %vm570_vm0 = vcmask 7168  }
  0x13   :  { %640 = vmatprep.subr.bf16.mxu0 %v751_v0  ;;  %688 = vmatprep.subr.bf16.mxu1 %v751_v0  ;;  %v155_v3 = vld [vmem:[%s1164_s1 + $0x10] sm:$0xff]  ;;  %v641_v4 = vpack.c.bf16 %v154_v2, %v153_v1  ;;  %v156_v5 = vld [vmem:[%s1164_s1 + $0x18] sm:$0xff]  ;;  %v157_v7 = vld [vmem:[%s1164_s1 + $0x20] sm:$0xff] }
  0x14   :  { %v644_v6 = vpack.c.bf16 %v156_v5, %v155_v3  ;;  %v158_v8 = vld [vmem:[%s1164_s1 + $0x28] sm:$0xff]  ;;  %v159_v10 = vld [vmem:[%s1164_s1 + $0x30] sm:$0xff]  ;;  %v160_v11 = vld [vmem:[%s1164_s1 + $0x38] sm:$0xff] }
  0x15   :  { %642 = vmatpush1.bf16.msra.mxu0 %v641_v4  ;;  %704 = vmatpush1.bf16.msra.mxu1 %v641_v4  ;;  %v647_v9 = vpack.c.bf16 %v158_v8, %v157_v7  ;;  %v26_v12 = vld [vmem:[#allocation2 + $0x8] sm:$0xff]  ;;  %v650_v13 = vpack.c.bf16 %v160_v11, %v159_v10  ;;  %v161_v15 = vld [vmem:[%s1164_s1 + $0x40] sm:$0xff]  ;;  %v163_v18 = vld [vmem:[%s1164_s1 + $0x50] sm:$0xff] }
  0x16   :  { %643 = vmatprep.subr.bf16.mxu0 %v751_v0  ;;  %689 = vmatprep.subr.bf16.mxu1 %v751_v0  ;;  %v90_v14 = vld [vmem:[#allocation2 + $0x208] sm:$0xff]  ;;  %v164_v19 = vld [vmem:[%s1164_s1 + $0x58] sm:$0xff]  ;;  %v165_v21 = vld [vmem:[%s1164_s1 + $0x60] sm:$0xff] }
  0x17   :  { %v162_v16 = vld [vmem:[%s1164_s1 + $0x48] sm:$0xff]  ;;  %249 = vmatprep.mubr.f32.mxu0 %v26_v12  ;;  %409 = vmatprep.mubr.f32.mxu1 %v90_v14  ;;  %v656_v20 = vpack.c.bf16 %v164_v19, %v163_v18  ;;  %v167_v24 = vld [vmem:[%s1164_s1 + $0x70] sm:$0xff]  ;;  %v168_v25 = vld [vmem:[%s1164_s1 + $0x78] sm:$0xff] }
  0x18   :  { %v653_v17 = vpack.c.bf16 %v162_v16, %v161_v15  ;;  %v166_v22 = vld [vmem:[%s1164_s1 + $0x68] sm:$0xff]  ;;  %v662_v26 = vpack.c.bf16 %v168_v25, %v167_v24  ;;  %v169_v27 = vld [vmem:[%s1164_s1 + $0x80] sm:$0xff]  ;;  %v171_v30 = vld [vmem:[%s1164_s1 + $0x90] sm:$0xff] }
  0x19   :  { %645 = vmatpush1.bf16.msra.mxu0 %v644_v6  ;;  %705 = vmatpush1.bf16.msra.mxu1 %v644_v6  ;;  %v659_v23 = vpack.c.bf16 %v166_v22, %v165_v21  ;;  %v170_v28 = vld [vmem:[%s1164_s1 + $0x88] sm:$0xff]  ;;  %v172_v31 = vld [vmem:[%s1164_s1 + $0x98] sm:$0xff]  ;;  %v173_v33 = vld [vmem:[%s1164_s1 + $0xa0] sm:$0xff] }
  0x1a   :  { %646 = vmatprep.subr.bf16.mxu0 %v751_v0  ;;  %690 = vmatprep.subr.bf16.mxu1 %v751_v0  ;;  %v665_v29 = vpack.c.bf16 %v170_v28, %v169_v27  ;;  %v668_v32 = vpack.c.bf16 %v172_v31, %v171_v30  ;;  %v174_v34 = vld [vmem:[%s1164_s1 + $0xa8] sm:$0xff]  ;;  %v175_v36 = vld [vmem:[%s1164_s1 + $0xb0] sm:$0xff]  ;;  %v176_v37 = vld [vmem:[%s1164_s1 + $0xb8] sm:$0xff] }
  0x1b   :  { %v671_v35 = vpack.c.bf16 %v174_v34, %v173_v33  ;;  %v674_v38 = vpack.c.bf16 %v176_v37, %v175_v36  ;;  %v177_v39 = vld [vmem:[%s1164_s1 + $0xc0] sm:$0xff]  ;;  %v178_v40 = vld [vmem:[%s1164_s1 + $0xc8] sm:$0xff]  ;;  %v179_v42 = vld [vmem:[%s1164_s1 + $0xd0] sm:$0xff] }
  0x1c   :  { %v677_v41 = vpack.c.bf16 %v178_v40, %v177_v39  ;;  %v180_v43 = vld [vmem:[%s1164_s1 + $0xd8] sm:$0xff]  ;;  %v181_v45 = vld [vmem:[%s1164_s1 + $0xe0] sm:$0xff]  ;;  %v182_v46 = vld [vmem:[%s1164_s1 + $0xe8] sm:$0xff] }
  0x1d   :  { %648 = vmatpush1.bf16.msra.mxu0 %v647_v9  ;;  %706 = vmatpush1.bf16.msra.mxu1 %v647_v9  ;;  %v680_v44 = vpack.c.bf16 %v180_v43, %v179_v42  ;;  %v683_v47 = vpack.c.bf16 %v182_v46, %v181_v45  ;;  %v183_v48 = vld [vmem:[%s1164_s1 + $0xf0] sm:$0xff]  ;;  %v184_v49 = vld [vmem:[%s1164_s1 + $0xf8] sm:$0xff]  ;;  %v25_v51 = vld [vmem:[#allocation2] sm:$0xff] }
  0x1e   :  { %649 = vmatprep.subr.bf16.mxu0 %v751_v0  ;;  %691 = vmatprep.subr.bf16.mxu1 %v751_v0  ;;  %v686_v50 = vpack.c.bf16 %v184_v49, %v183_v48  ;;  %v89_v52 = vld [vmem:[#allocation2 + $0x200] sm:$0xff]  ;;  %v28_v53 = vld [vmem:[#allocation2 + $0x18] sm:$0xff]  ;;  %v27_v55 = vld [vmem:[#allocation2 + $0x10] sm:$0xff] }
  0x1f   :  { %v92_v54 = vld [vmem:[#allocation2 + $0x218] sm:$0xff]  ;;  %v91_v56 = vld [vmem:[#allocation2 + $0x210] sm:$0xff]  ;;  %v30_v57 = vld [vmem:[#allocation2 + $0x28] sm:$0xff] }
  0x20   :  { %v94_v58 = vld [vmem:[#allocation2 + $0x228] sm:$0xff]  ;;  %v29_v59 = vld [vmem:[#allocation2 + $0x20] sm:$0xff]  ;;  %v32_v61 = vld [vmem:[#allocation2 + $0x38] sm:$0xff] }
  0x21   :  { %651 = vmatpush1.bf16.msra.mxu0 %v650_v13  ;;  %707 = vmatpush1.bf16.msra.mxu1 %v650_v13  ;;  %v93_v60 = vld [vmem:[#allocation2 + $0x220] sm:$0xff]  ;;  %v96_v62 = vld [vmem:[#allocation2 + $0x238] sm:$0xff]  ;;  %v31_v63 = vld [vmem:[#allocation2 + $0x30] sm:$0xff] }
  0x22   :  { %652 = vmatprep.subr.bf16.mxu0 %v751_v0  ;;  %692 = vmatprep.subr.bf16.mxu1 %v751_v0  ;;  %v34_v1 = vld [vmem:[#allocation2 + $0x48] sm:$0xff]  ;;  %v33_v3 = vld [vmem:[#allocation2 + $0x40] sm:$0xff]  ;;  %v36_v5 = vld [vmem:[#allocation2 + $0x58] sm:$0xff] }
  0x23   :  { %v98_v2 = vld [vmem:[#allocation2 + $0x248] sm:$0xff]  ;;  %v97_v4 = vld [vmem:[#allocation2 + $0x240] sm:$0xff]  ;;  %v100_v6 = vld [vmem:[#allocation2 + $0x258] sm:$0xff] }
  0x24   :  { %v35_v7 = vld [vmem:[#allocation2 + $0x50] sm:$0xff]  ;;  %v38_v9 = vld [vmem:[#allocation2 + $0x68] sm:$0xff]  ;;  %v37_v11 = vld [vmem:[#allocation2 + $0x60] sm:$0xff] }
  0x25   :  { %654 = vmatpush1.bf16.msra.mxu0 %v653_v17  ;;  %708 = vmatpush1.bf16.msra.mxu1 %v653_v17  ;;  %v99_v8 = vld [vmem:[#allocation2 + $0x250] sm:$0xff]  ;;  %v102_v10 = vld [vmem:[#allocation2 + $0x268] sm:$0xff]  ;;  %v101_v12 = vld [vmem:[#allocation2 + $0x260] sm:$0xff] }
  0x26   :  { %655 = vmatprep.subr.bf16.mxu0 %v751_v0  ;;  %693 = vmatprep.subr.bf16.mxu1 %v751_v0  ;;  %v40_v13 = vld [vmem:[#allocation2 + $0x78] sm:$0xff]  ;;  %v39_v15 = vld [vmem:[#allocation2 + $0x70] sm:$0xff]  ;;  %v42_v17 = vld [vmem:[#allocation2 + $0x88] sm:$0xff] }
  0x27   :  { %v104_v14 = vld [vmem:[#allocation2 + $0x278] sm:$0xff]  ;;  %v103_v16 = vld [vmem:[#allocation2 + $0x270] sm:$0xff]  ;;  %v106_v18 = vld [vmem:[#allocation2 + $0x288] sm:$0xff] }
  0x28   :  { %v41_v19 = vld [vmem:[#allocation2 + $0x80] sm:$0xff]  ;;  %v44_v21 = vld [vmem:[#allocation2 + $0x98] sm:$0xff]  ;;  %v107_v24 = vld [vmem:[#allocation2 + $0x290] sm:$0xff] }
  0x29   :  { %657 = vmatpush1.bf16.msra.mxu0 %v656_v20  ;;  %709 = vmatpush1.bf16.msra.mxu1 %v656_v20  ;;  %v105_v20 = vld [vmem:[#allocation2 + $0x280] sm:$0xff]  ;;  %v108_v22 = vld [vmem:[#allocation2 + $0x298] sm:$0xff]  ;;  %v46_v25 = vld [vmem:[#allocation2 + $0xa8] sm:$0xff] }
  0x2a   :  { %658 = vmatprep.subr.bf16.mxu0 %v751_v0  ;;  %694 = vmatprep.subr.bf16.mxu1 %v751_v0  ;;  %v45_v27 = vld [vmem:[#allocation2 + $0xa0] sm:$0xff]  ;;  %v112_v30 = vld [vmem:[#allocation2 + $0x2b8] sm:$0xff]  ;;  %v47_v31 = vld [vmem:[#allocation2 + $0xb0] sm:$0xff] }
  0x2b   :  { %v109_v28 = vld [vmem:[#allocation2 + $0x2a0] sm:$0xff]  ;;  %v50_v33 = vld [vmem:[#allocation2 + $0xc8] sm:$0xff]  ;;  %v52_v37 = vld [vmem:[#allocation2 + $0xd8] sm:$0xff] }
  0x2c   :  { %v114_v34 = vld [vmem:[#allocation2 + $0x2c8] sm:$0xff]  ;;  %v113_v36 = vld [vmem:[#allocation2 + $0x2c0] sm:$0xff]  ;;  %v51_v39 = vld [vmem:[#allocation2 + $0xd0] sm:$0xff] }
  0x2d   :  { %660 = vmatpush1.bf16.msra.mxu0 %v659_v23  ;;  %710 = vmatpush1.bf16.msra.mxu1 %v659_v23  ;;  %v43_v23 = vld [vmem:[#allocation2 + $0x90] sm:$0xff]  ;;  %v118_v42 = vld [vmem:[#allocation2 + $0x2e8] sm:$0xff]  ;;  %v53_v43 = vld [vmem:[#allocation2 + $0xe0] sm:$0xff] }
  0x2e   :  { %661 = vmatprep.subr.bf16.mxu0 %v751_v0  ;;  %695 = vmatprep.subr.bf16.mxu1 %v751_v0  ;;  %v115_v40 = vld [vmem:[#allocation2 + $0x2d0] sm:$0xff]  ;;  %v56_v45 = vld [vmem:[#allocation2 + $0xf8] sm:$0xff]  ;;  %v58_v49 = vld [vmem:[#allocation2 + $0x108] sm:$0xff] }
  0x2f   :  { %v120_v46 = vld [vmem:[#allocation2 + $0x2f8] sm:$0xff]  ;;  %v119_v48 = vld [vmem:[#allocation2 + $0x2f0] sm:$0xff] }
  0x31   :  { %663 = vmatpush1.bf16.msra.mxu0 %v662_v26  ;;  %711 = vmatpush1.bf16.msra.mxu1 %v662_v26  ;;  %v110_v26 = vld [vmem:[#allocation2 + $0x2a8] sm:$0xff] }
  0x32   :  { %664 = vmatprep.subr.bf16.mxu0 %v751_v0  ;;  %696 = vmatprep.subr.bf16.mxu1 %v751_v0 }
  0x35   :  { %666 = vmatpush1.bf16.msra.mxu0 %v665_v29  ;;  %712 = vmatpush1.bf16.msra.mxu1 %v665_v29  ;;  %v48_v29 = vld [vmem:[#allocation2 + $0xb8] sm:$0xff] }
  0x36   :  { %667 = vmatprep.subr.bf16.mxu0 %v751_v0  ;;  %697 = vmatprep.subr.bf16.mxu1 %v751_v0 }
  0x39   :  { %669 = vmatpush1.bf16.msra.mxu0 %v668_v32  ;;  %713 = vmatpush1.bf16.msra.mxu1 %v668_v32  ;;  %v111_v32 = vld [vmem:[#allocation2 + $0x2b0] sm:$0xff] }
  0x3a   :  { %670 = vmatprep.subr.bf16.mxu0 %v751_v0  ;;  %698 = vmatprep.subr.bf16.mxu1 %v751_v0 }
  0x3d   :  { %672 = vmatpush1.bf16.msra.mxu0 %v671_v35  ;;  %714 = vmatpush1.bf16.msra.mxu1 %v671_v35  ;;  %v49_v35 = vld [vmem:[#allocation2 + $0xc0] sm:$0xff] }
  0x3e   :  { %673 = vmatprep.subr.bf16.mxu0 %v751_v0  ;;  %699 = vmatprep.subr.bf16.mxu1 %v751_v0 }
  0x41   :  { %675 = vmatpush1.bf16.msra.mxu0 %v674_v38  ;;  %715 = vmatpush1.bf16.msra.mxu1 %v674_v38  ;;  %v116_v38 = vld [vmem:[#allocation2 + $0x2d8] sm:$0xff] }
  0x42   :  { %676 = vmatprep.subr.bf16.mxu0 %v751_v0  ;;  %700 = vmatprep.subr.bf16.mxu1 %v751_v0 }
  0x45   :  { %678 = vmatpush1.bf16.msra.mxu0 %v677_v41  ;;  %716 = vmatpush1.bf16.msra.mxu1 %v677_v41  ;;  %v54_v41 = vld [vmem:[#allocation2 + $0xe8] sm:$0xff] }
  0x46   :  { %679 = vmatprep.subr.bf16.mxu0 %v751_v0  ;;  %701 = vmatprep.subr.bf16.mxu1 %v751_v0 }
  0x49   :  { %681 = vmatpush1.bf16.msra.mxu0 %v680_v44  ;;  %717 = vmatpush1.bf16.msra.mxu1 %v680_v44  ;;  %v117_v44 = vld [vmem:[#allocation2 + $0x2e0] sm:$0xff] }
  0x4a   :  { %682 = vmatprep.subr.bf16.mxu0 %v751_v0  ;;  %702 = vmatprep.subr.bf16.mxu1 %v751_v0 }
  0x4d   :  { %684 = vmatpush1.bf16.msra.mxu0 %v683_v47  ;;  %718 = vmatpush1.bf16.msra.mxu1 %v683_v47  ;;  %v55_v47 = vld [vmem:[#allocation2 + $0xf0] sm:$0xff] }
  0x4e   :  { %685 = vmatprep.subr.bf16.mxu0 %v751_v0  ;;  %703 = vmatprep.subr.bf16.mxu1 %v751_v0  ;;  %v95_v0 = vld [vmem:[#allocation2 + $0x230] sm:$0xff] }
  0x51   :  { %687 = vmatpush1.bf16.msra.mxu0 %v686_v50  ;;  %719 = vmatpush1.bf16.msra.mxu1 %v686_v50  ;;  %v122_v50 = vld [vmem:[#allocation2 + $0x308] sm:$0xff] }
  0x54   :  { %250 = vmatmul.mubr.f32.vlgmr.msra.gmra.mrb[0].mxu0 %v25_v51  ;;  %410 = vmatmul.mubr.f32.vlgmr.msra.gmra.mrb[0].mxu1 %v89_v52  ;;  %v57_v51 = vld [vmem:[#allocation2 + $0x100] sm:$0xff] }
  0x55   :  { %254 = vmatprep.mubr.f32.mxu0 %v28_v53  ;;  %414 = vmatprep.mubr.f32.mxu1 %v92_v54  ;;  %v121_v52 = vld [vmem:[#allocation2 + $0x300] sm:$0xff]  ;;  %v60_v53 = vld [vmem:[#allocation2 + $0x118] sm:$0xff] }
  0x56   :  { %v124_v54 = vld [vmem:[#allocation2 + $0x318] sm:$0xff] }
  0x58   :  { %255 = vmatmul.mubr.f32.gmra.mrb[2].mxu0 %v27_v55  ;;  %415 = vmatmul.mubr.f32.gmra.mrb[2].mxu1 %v91_v56  ;;  %v59_v55 = vld [vmem:[#allocation2 + $0x110] sm:$0xff] }
  0x59   :  { %259 = vmatprep.mubr.f32.mxu0 %v30_v57  ;;  %419 = vmatprep.mubr.f32.mxu1 %v94_v58  ;;  %v123_v56 = vld [vmem:[#allocation2 + $0x310] sm:$0xff]  ;;  %v62_v57 = vld [vmem:[#allocation2 + $0x128] sm:$0xff] }
  0x5a   :  { %v126_v58 = vld [vmem:[#allocation2 + $0x328] sm:$0xff] }
  0x5c   :  { %260 = vmatmul.mubr.f32.gmra.mrb[4].mxu0 %v29_v59  ;;  %420 = vmatmul.mubr.f32.gmra.mrb[4].mxu1 %v93_v60  ;;  %v61_v59 = vld [vmem:[#allocation2 + $0x120] sm:$0xff] }
  0x5d   :  { %264 = vmatprep.mubr.f32.mxu0 %v32_v61  ;;  %424 = vmatprep.mubr.f32.mxu1 %v96_v62  ;;  %v125_v60 = vld [vmem:[#allocation2 + $0x320] sm:$0xff]  ;;  %v64_v61 = vld [vmem:[#allocation2 + $0x138] sm:$0xff] }
  0x5e   :  { %v128_v62 = vld [vmem:[#allocation2 + $0x338] sm:$0xff] }
  0x60   :  { %265 = vmatmul.mubr.f32.gmra.mrb[6].mxu0 %v31_v63  ;;  %425 = vmatmul.mubr.f32.gmra.mrb[6].mxu1 %v95_v0  ;;  %v63_v63 = vld [vmem:[#allocation2 + $0x130] sm:$0xff] }
  0x61   :  { %269 = vmatprep.mubr.f32.mxu0 %v34_v1  ;;  %429 = vmatprep.mubr.f32.mxu1 %v98_v2  ;;  %v127_v0 = vld [vmem:[#allocation2 + $0x330] sm:$0xff]  ;;  %v66_v1 = vld [vmem:[#allocation2 + $0x148] sm:$0xff] }
  0x62   :  { %v130_v2 = vld [vmem:[#allocation2 + $0x348] sm:$0xff] }
  0x64   :  { %270 = vmatmul.mubr.f32.gmra.mrb[8].mxu0 %v33_v3  ;;  %430 = vmatmul.mubr.f32.gmra.mrb[8].mxu1 %v97_v4  ;;  %v65_v3 = vld [vmem:[#allocation2 + $0x140] sm:$0xff] }
  0x65   :  { %274 = vmatprep.mubr.f32.mxu0 %v36_v5  ;;  %434 = vmatprep.mubr.f32.mxu1 %v100_v6  ;;  %v129_v4 = vld [vmem:[#allocation2 + $0x340] sm:$0xff]  ;;  %v68_v5 = vld [vmem:[#allocation2 + $0x158] sm:$0xff] }
  0x66   :  { %v132_v6 = vld [vmem:[#allocation2 + $0x358] sm:$0xff] }
  0x68   :  { %275 = vmatmul.mubr.f32.gmra.mrb[10].mxu0 %v35_v7  ;;  %435 = vmatmul.mubr.f32.gmra.mrb[10].mxu1 %v99_v8  ;;  %v67_v7 = vld [vmem:[#allocation2 + $0x150] sm:$0xff] }
  0x69   :  { %279 = vmatprep.mubr.f32.mxu0 %v38_v9  ;;  %439 = vmatprep.mubr.f32.mxu1 %v102_v10  ;;  %v131_v8 = vld [vmem:[#allocation2 + $0x350] sm:$0xff]  ;;  %v70_v9 = vld [vmem:[#allocation2 + $0x168] sm:$0xff] }
  0x6a   :  { %v134_v10 = vld [vmem:[#allocation2 + $0x368] sm:$0xff] }
  0x6c   :  { %280 = vmatmul.mubr.f32.gmra.mrb[12].mxu0 %v37_v11  ;;  %440 = vmatmul.mubr.f32.gmra.mrb[12].mxu1 %v101_v12  ;;  %v69_v11 = vld [vmem:[#allocation2 + $0x160] sm:$0xff] }
  0x6d   :  { %284 = vmatprep.mubr.f32.mxu0 %v40_v13  ;;  %444 = vmatprep.mubr.f32.mxu1 %v104_v14  ;;  %v133_v12 = vld [vmem:[#allocation2 + $0x360] sm:$0xff]  ;;  %v72_v13 = vld [vmem:[#allocation2 + $0x178] sm:$0xff] }
  0x6e   :  { %v136_v14 = vld [vmem:[#allocation2 + $0x378] sm:$0xff] }
  0x70   :  { %285 = vmatmul.mubr.f32.gmra.mrb[14].mxu0 %v39_v15  ;;  %445 = vmatmul.mubr.f32.gmra.mrb[14].mxu1 %v103_v16  ;;  %v71_v15 = vld [vmem:[#allocation2 + $0x170] sm:$0xff] }
  0x71   :  { %289 = vmatprep.mubr.f32.mxu0 %v42_v17  ;;  %449 = vmatprep.mubr.f32.mxu1 %v106_v18  ;;  %v135_v16 = vld [vmem:[#allocation2 + $0x370] sm:$0xff]  ;;  %v74_v17 = vld [vmem:[#allocation2 + $0x188] sm:$0xff] }
  0x72   :  { %v138_v18 = vld [vmem:[#allocation2 + $0x388] sm:$0xff] }
  0x74   :  { %290 = vmatmul.mubr.f32.gmra.mrb[16].mxu0 %v41_v19  ;;  %450 = vmatmul.mubr.f32.gmra.mrb[16].mxu1 %v105_v20  ;;  %v73_v19 = vld [vmem:[#allocation2 + $0x180] sm:$0xff] }
  0x75   :  { %294 = vmatprep.mubr.f32.mxu0 %v44_v21  ;;  %454 = vmatprep.mubr.f32.mxu1 %v108_v22  ;;  %v137_v20 = vld [vmem:[#allocation2 + $0x380] sm:$0xff]  ;;  %v76_v21 = vld [vmem:[#allocation2 + $0x198] sm:$0xff] }
  0x76   :  { %v140_v22 = vld [vmem:[#allocation2 + $0x398] sm:$0xff] }
  0x78   :  { %295 = vmatmul.mubr.f32.gmra.mrb[18].mxu0 %v43_v23  ;;  %455 = vmatmul.mubr.f32.gmra.mrb[18].mxu1 %v107_v24  ;;  %v75_v23 = vld [vmem:[#allocation2 + $0x190] sm:$0xff] }
  0x79   :  { %299 = vmatprep.mubr.f32.mxu0 %v46_v25  ;;  %459 = vmatprep.mubr.f32.mxu1 %v110_v26  ;;  %v139_v24 = vld [vmem:[#allocation2 + $0x390] sm:$0xff]  ;;  %v78_v25 = vld [vmem:[#allocation2 + $0x1a8] sm:$0xff] }
  0x7a   :  { %v142_v26 = vld [vmem:[#allocation2 + $0x3a8] sm:$0xff] }
  0x7c   :  { %300 = vmatmul.mubr.f32.gmra.mrb[20].mxu0 %v45_v27  ;;  %460 = vmatmul.mubr.f32.gmra.mrb[20].mxu1 %v109_v28  ;;  %v77_v27 = vld [vmem:[#allocation2 + $0x1a0] sm:$0xff] }
  0x7d   :  { %304 = vmatprep.mubr.f32.mxu0 %v48_v29  ;;  %464 = vmatprep.mubr.f32.mxu1 %v112_v30  ;;  %v141_v28 = vld [vmem:[#allocation2 + $0x3a0] sm:$0xff]  ;;  %v80_v29 = vld [vmem:[#allocation2 + $0x1b8] sm:$0xff] }
  0x7e   :  { %v144_v30 = vld [vmem:[#allocation2 + $0x3b8] sm:$0xff] }
  0x80   :  { %305 = vmatmul.mubr.f32.gmra.mrb[22].mxu0 %v47_v31  ;;  %465 = vmatmul.mubr.f32.gmra.mrb[22].mxu1 %v111_v32  ;;  %v79_v31 = vld [vmem:[#allocation2 + $0x1b0] sm:$0xff] }
  0x81   :  { %309 = vmatprep.mubr.f32.mxu0 %v50_v33  ;;  %469 = vmatprep.mubr.f32.mxu1 %v114_v34  ;;  %v143_v32 = vld [vmem:[#allocation2 + $0x3b0] sm:$0xff]  ;;  %v82_v33 = vld [vmem:[#allocation2 + $0x1c8] sm:$0xff] }
  0x82   :  { %v146_v34 = vld [vmem:[#allocation2 + $0x3c8] sm:$0xff] }
  0x84   :  { %310 = vmatmul.mubr.f32.gmra.mrb[24].mxu0 %v49_v35  ;;  %470 = vmatmul.mubr.f32.gmra.mrb[24].mxu1 %v113_v36  ;;  %v81_v35 = vld [vmem:[#allocation2 + $0x1c0] sm:$0xff] }
  0x85   :  { %314 = vmatprep.mubr.f32.mxu0 %v52_v37  ;;  %474 = vmatprep.mubr.f32.mxu1 %v116_v38  ;;  %v145_v36 = vld [vmem:[#allocation2 + $0x3c0] sm:$0xff]  ;;  %v84_v37 = vld [vmem:[#allocation2 + $0x1d8] sm:$0xff] }
  0x86   :  { %v148_v38 = vld [vmem:[#allocation2 + $0x3d8] sm:$0xff] }
  0x88   :  { %315 = vmatmul.mubr.f32.gmra.mrb[26].mxu0 %v51_v39  ;;  %475 = vmatmul.mubr.f32.gmra.mrb[26].mxu1 %v115_v40  ;;  %v83_v39 = vld [vmem:[#allocation2 + $0x1d0] sm:$0xff] }
  0x89   :  { %319 = vmatprep.mubr.f32.mxu0 %v54_v41  ;;  %479 = vmatprep.mubr.f32.mxu1 %v118_v42  ;;  %v147_v40 = vld [vmem:[#allocation2 + $0x3d0] sm:$0xff]  ;;  %v86_v41 = vld [vmem:[#allocation2 + $0x1e8] sm:$0xff] }
  0x8a   :  { %v150_v42 = vld [vmem:[#allocation2 + $0x3e8] sm:$0xff] }
  0x8c   :  { %320 = vmatmul.mubr.f32.gmra.mrb[28].mxu0 %v53_v43  ;;  %480 = vmatmul.mubr.f32.gmra.mrb[28].mxu1 %v117_v44  ;;  %v85_v43 = vld [vmem:[#allocation2 + $0x1e0] sm:$0xff] }
  0x8d   :  { %324 = vmatprep.mubr.f32.mxu0 %v56_v45  ;;  %484 = vmatprep.mubr.f32.mxu1 %v120_v46  ;;  %v149_v44 = vld [vmem:[#allocation2 + $0x3e0] sm:$0xff]  ;;  %v88_v45 = vld [vmem:[#allocation2 + $0x1f8] sm:$0xff] }
  0x8e   :  { %v152_v46 = vld [vmem:[#allocation2 + $0x3f8] sm:$0xff] }
  0x90   :  { %325 = vmatmul.mubr.f32.gmra.mrb[30].mxu0 %v55_v47  ;;  %485 = vmatmul.mubr.f32.gmra.mrb[30].mxu1 %v119_v48  ;;  %v87_v47 = vld [vmem:[#allocation2 + $0x1f0] sm:$0xff] }
  0x91   :  { %329 = vmatprep.mubr.f32.mxu0 %v58_v49  ;;  %489 = vmatprep.mubr.f32.mxu1 %v122_v50  ;;  %v151_v48 = vld [vmem:[#allocation2 + $0x3f0] sm:$0xff] }
  0x94   :  { %330 = vmatmul.mubr.f32.gmra.mrb[32].mxu0 %v57_v51  ;;  %490 = vmatmul.mubr.f32.gmra.mrb[32].mxu1 %v121_v52 }
  0x95   :  { %334 = vmatprep.mubr.f32.mxu0 %v60_v53  ;;  %494 = vmatprep.mubr.f32.mxu1 %v124_v54 }
  0x98   :  { %335 = vmatmul.mubr.f32.gmra.mrb[34].mxu0 %v59_v55  ;;  %495 = vmatmul.mubr.f32.gmra.mrb[34].mxu1 %v123_v56 }
  0x99   :  { %339 = vmatprep.mubr.f32.mxu0 %v62_v57  ;;  %499 = vmatprep.mubr.f32.mxu1 %v126_v58 }
  0x9c   :  { %340 = vmatmul.mubr.f32.gmra.mrb[36].mxu0 %v61_v59  ;;  %500 = vmatmul.mubr.f32.gmra.mrb[36].mxu1 %v125_v60 }
  0x9d   :  { %344 = vmatprep.mubr.f32.mxu0 %v64_v61  ;;  %504 = vmatprep.mubr.f32.mxu1 %v128_v62 }
  0xa0   :  { %345 = vmatmul.mubr.f32.gmra.mrb[38].mxu0 %v63_v63  ;;  %505 = vmatmul.mubr.f32.gmra.mrb[38].mxu1 %v127_v0 }
  0xa1   :  { %349 = vmatprep.mubr.f32.mxu0 %v66_v1  ;;  %509 = vmatprep.mubr.f32.mxu1 %v130_v2 }
  0xa4   :  { %350 = vmatmul.mubr.f32.gmra.mrb[40].mxu0 %v65_v3  ;;  %510 = vmatmul.mubr.f32.gmra.mrb[40].mxu1 %v129_v4 }
  0xa5   :  { %354 = vmatprep.mubr.f32.mxu0 %v68_v5  ;;  %514 = vmatprep.mubr.f32.mxu1 %v132_v6 }
  0xa8   :  { %355 = vmatmul.mubr.f32.gmra.mrb[42].mxu0 %v67_v7  ;;  %515 = vmatmul.mubr.f32.gmra.mrb[42].mxu1 %v131_v8 }
  0xa9   :  { %359 = vmatprep.mubr.f32.mxu0 %v70_v9  ;;  %519 = vmatprep.mubr.f32.mxu1 %v134_v10 }
  0xac   :  { %360 = vmatmul.mubr.f32.gmra.mrb[44].mxu0 %v69_v11  ;;  %520 = vmatmul.mubr.f32.gmra.mrb[44].mxu1 %v133_v12 }
  0xad   :  { %364 = vmatprep.mubr.f32.mxu0 %v72_v13  ;;  %524 = vmatprep.mubr.f32.mxu1 %v136_v14 }
  0xb0   :  { %365 = vmatmul.mubr.f32.gmra.mrb[46].mxu0 %v71_v15  ;;  %525 = vmatmul.mubr.f32.gmra.mrb[46].mxu1 %v135_v16 }
  0xb1   :  { %369 = vmatprep.mubr.f32.mxu0 %v74_v17  ;;  %529 = vmatprep.mubr.f32.mxu1 %v138_v18 }
  0xb4   :  { %370 = vmatmul.mubr.f32.gmra.mrb[48].mxu0 %v73_v19  ;;  %530 = vmatmul.mubr.f32.gmra.mrb[48].mxu1 %v137_v20 }
  0xb5   :  { %374 = vmatprep.mubr.f32.mxu0 %v76_v21  ;;  %534 = vmatprep.mubr.f32.mxu1 %v140_v22 }
  0xb8   :  { %375 = vmatmul.mubr.f32.gmra.mrb[50].mxu0 %v75_v23  ;;  %535 = vmatmul.mubr.f32.gmra.mrb[50].mxu1 %v139_v24 }
  0xb9   :  { %379 = vmatprep.mubr.f32.mxu0 %v78_v25  ;;  %539 = vmatprep.mubr.f32.mxu1 %v142_v26 }
  0xbc   :  { %380 = vmatmul.mubr.f32.gmra.mrb[52].mxu0 %v77_v27  ;;  %540 = vmatmul.mubr.f32.gmra.mrb[52].mxu1 %v141_v28 }
  0xbd   :  { %384 = vmatprep.mubr.f32.mxu0 %v80_v29  ;;  %544 = vmatprep.mubr.f32.mxu1 %v144_v30 }
  0xc0   :  { %385 = vmatmul.mubr.f32.gmra.mrb[54].mxu0 %v79_v31  ;;  %545 = vmatmul.mubr.f32.gmra.mrb[54].mxu1 %v143_v32 }
  0xc1   :  { %389 = vmatprep.mubr.f32.mxu0 %v82_v33  ;;  %549 = vmatprep.mubr.f32.mxu1 %v146_v34 }
  0xc4   :  { %390 = vmatmul.mubr.f32.gmra.mrb[56].mxu0 %v81_v35  ;;  %550 = vmatmul.mubr.f32.gmra.mrb[56].mxu1 %v145_v36 }
  0xc5   :  { %394 = vmatprep.mubr.f32.mxu0 %v84_v37  ;;  %554 = vmatprep.mubr.f32.mxu1 %v148_v38 }
  0xc8   :  { %395 = vmatmul.mubr.f32.gmra.mrb[58].mxu0 %v83_v39  ;;  %555 = vmatmul.mubr.f32.gmra.mrb[58].mxu1 %v147_v40 }
  0xc9   :  { %399 = vmatprep.mubr.f32.mxu0 %v86_v41  ;;  %559 = vmatprep.mubr.f32.mxu1 %v150_v42 }
  0xcc   :  { %400 = vmatmul.mubr.f32.gmra.mrb[60].mxu0 %v85_v43  ;;  %560 = vmatmul.mubr.f32.gmra.mrb[60].mxu1 %v149_v44 }
  0xcd   :  { %404 = vmatprep.mubr.f32.mxu0 %v88_v45  ;;  %564 = vmatprep.mubr.f32.mxu1 %v152_v46 }
  0xd0   :  { %405 = vmatmul.mubr.f32.gmra.mrb[62].mxu0 %v87_v47  ;;  %565 = vmatmul.mubr.f32.gmra.mrb[62].mxu1 %v151_v48 }
 0x127   :  { %v251_v49 = vpop.f32.mrb[0].mxu0  ;;  %v411_v50 = vpop.f32.mrb[0].mxu1 }
 0x128   :  { %571 = vst.msk [vmem:[%s1165_s2] sm:$0xff] %vm570_vm0, %v251_v49  ;;  %603 = vst.msk [vmem:[%s1165_s2 + $0x100] sm:$0xff] %vm570_vm0, %v411_v50  ;;  %v253_v51 = vpop.f32.mrb[1].mxu0  ;;  %v413_v52 = vpop.f32.mrb[1].mxu1 }
 0x12b   :  { %v256_v53 = vpop.f32.mrb[2].mxu0  ;;  %v416_v54 = vpop.f32.mrb[2].mxu1 }
 0x12c   :  { %572 = vst.msk [vmem:[%s1165_s2 + $0x8] sm:$0xff] %vm570_vm0, %v256_v53  ;;  %604 = vst.msk [vmem:[%s1165_s2 + $0x108] sm:$0xff] %vm570_vm0, %v416_v54  ;;  %v258_v55 = vpop.f32.mrb[3].mxu0  ;;  %v418_v56 = vpop.f32.mrb[3].mxu1 }
 0x12f   :  { %v261_v57 = vpop.f32.mrb[4].mxu0  ;;  %v421_v58 = vpop.f32.mrb[4].mxu1 }
 0x130   :  { %573 = vst.msk [vmem:[%s1165_s2 + $0x10] sm:$0xff] %vm570_vm0, %v261_v57  ;;  %605 = vst.msk [vmem:[%s1165_s2 + $0x110] sm:$0xff] %vm570_vm0, %v421_v58  ;;  %v263_v59 = vpop.f32.mrb[5].mxu0  ;;  %v423_v60 = vpop.f32.mrb[5].mxu1 }
 0x133   :  { %v266_v61 = vpop.f32.mrb[6].mxu0  ;;  %v426_v62 = vpop.f32.mrb[6].mxu1 }
 0x134   :  { %574 = vst.msk [vmem:[%s1165_s2 + $0x18] sm:$0xff] %vm570_vm0, %v266_v61  ;;  %606 = vst.msk [vmem:[%s1165_s2 + $0x118] sm:$0xff] %vm570_vm0, %v426_v62  ;;  %v268_v63 = vpop.f32.mrb[7].mxu0  ;;  %v428_v0 = vpop.f32.mrb[7].mxu1 }
 0x137   :  { %v271_v1 = vpop.f32.mrb[8].mxu0  ;;  %v431_v2 = vpop.f32.mrb[8].mxu1 }
 0x138   :  { %575 = vst.msk [vmem:[%s1165_s2 + $0x20] sm:$0xff] %vm570_vm0, %v271_v1  ;;  %607 = vst.msk [vmem:[%s1165_s2 + $0x120] sm:$0xff] %vm570_vm0, %v431_v2  ;;  %v273_v3 = vpop.f32.mrb[9].mxu0  ;;  %v433_v4 = vpop.f32.mrb[9].mxu1 }
 0x13b   :  { %v276_v5 = vpop.f32.mrb[10].mxu0  ;;  %v436_v6 = vpop.f32.mrb[10].mxu1 }
 0x13c   :  { %576 = vst.msk [vmem:[%s1165_s2 + $0x28] sm:$0xff] %vm570_vm0, %v276_v5  ;;  %608 = vst.msk [vmem:[%s1165_s2 + $0x128] sm:$0xff] %vm570_vm0, %v436_v6  ;;  %v278_v7 = vpop.f32.mrb[11].mxu0  ;;  %v438_v8 = vpop.f32.mrb[11].mxu1 }
 0x13f   :  { %v281_v9 = vpop.f32.mrb[12].mxu0  ;;  %v441_v10 = vpop.f32.mrb[12].mxu1 }
 0x140   :  { %577 = vst.msk [vmem:[%s1165_s2 + $0x30] sm:$0xff] %vm570_vm0, %v281_v9  ;;  %609 = vst.msk [vmem:[%s1165_s2 + $0x130] sm:$0xff] %vm570_vm0, %v441_v10  ;;  %v283_v11 = vpop.f32.mrb[13].mxu0  ;;  %v443_v12 = vpop.f32.mrb[13].mxu1 }
 0x143   :  { %v286_v13 = vpop.f32.mrb[14].mxu0  ;;  %v446_v14 = vpop.f32.mrb[14].mxu1 }
 0x144   :  { %578 = vst.msk [vmem:[%s1165_s2 + $0x38] sm:$0xff] %vm570_vm0, %v286_v13  ;;  %610 = vst.msk [vmem:[%s1165_s2 + $0x138] sm:$0xff] %vm570_vm0, %v446_v14  ;;  %v288_v15 = vpop.f32.mrb[15].mxu0  ;;  %v448_v16 = vpop.f32.mrb[15].mxu1 }
 0x147   :  { %v291_v17 = vpop.f32.mrb[16].mxu0  ;;  %v451_v18 = vpop.f32.mrb[16].mxu1 }
 0x148   :  { %579 = vst.msk [vmem:[%s1165_s2 + $0x40] sm:$0xff] %vm570_vm0, %v291_v17  ;;  %611 = vst.msk [vmem:[%s1165_s2 + $0x140] sm:$0xff] %vm570_vm0, %v451_v18  ;;  %v293_v19 = vpop.f32.mrb[17].mxu0  ;;  %v453_v20 = vpop.f32.mrb[17].mxu1 }
 0x14b   :  { %v296_v21 = vpop.f32.mrb[18].mxu0  ;;  %v456_v22 = vpop.f32.mrb[18].mxu1 }
 0x14c   :  { %580 = vst.msk [vmem:[%s1165_s2 + $0x48] sm:$0xff] %vm570_vm0, %v296_v21  ;;  %612 = vst.msk [vmem:[%s1165_s2 + $0x148] sm:$0xff] %vm570_vm0, %v456_v22  ;;  %v298_v23 = vpop.f32.mrb[19].mxu0  ;;  %v458_v24 = vpop.f32.mrb[19].mxu1 }
 0x14f   :  { %v301_v25 = vpop.f32.mrb[20].mxu0  ;;  %v461_v26 = vpop.f32.mrb[20].mxu1 }
 0x150   :  { %581 = vst.msk [vmem:[%s1165_s2 + $0x50] sm:$0xff] %vm570_vm0, %v301_v25  ;;  %613 = vst.msk [vmem:[%s1165_s2 + $0x150] sm:$0xff] %vm570_vm0, %v461_v26  ;;  %v303_v27 = vpop.f32.mrb[21].mxu0  ;;  %v463_v28 = vpop.f32.mrb[21].mxu1 }
 0x153   :  { %v306_v29 = vpop.f32.mrb[22].mxu0  ;;  %v466_v30 = vpop.f32.mrb[22].mxu1 }
 0x154   :  { %582 = vst.msk [vmem:[%s1165_s2 + $0x58] sm:$0xff] %vm570_vm0, %v306_v29  ;;  %614 = vst.msk [vmem:[%s1165_s2 + $0x158] sm:$0xff] %vm570_vm0, %v466_v30  ;;  %v308_v31 = vpop.f32.mrb[23].mxu0  ;;  %v468_v32 = vpop.f32.mrb[23].mxu1 }
 0x157   :  { %v311_v33 = vpop.f32.mrb[24].mxu0  ;;  %v471_v34 = vpop.f32.mrb[24].mxu1 }
 0x158   :  { %583 = vst.msk [vmem:[%s1165_s2 + $0x60] sm:$0xff] %vm570_vm0, %v311_v33  ;;  %615 = vst.msk [vmem:[%s1165_s2 + $0x160] sm:$0xff] %vm570_vm0, %v471_v34  ;;  %v313_v35 = vpop.f32.mrb[25].mxu0  ;;  %v473_v36 = vpop.f32.mrb[25].mxu1 }
 0x15b   :  { %v316_v37 = vpop.f32.mrb[26].mxu0  ;;  %v476_v38 = vpop.f32.mrb[26].mxu1 }
 0x15c   :  { %584 = vst.msk [vmem:[%s1165_s2 + $0x68] sm:$0xff] %vm570_vm0, %v316_v37  ;;  %616 = vst.msk [vmem:[%s1165_s2 + $0x168] sm:$0xff] %vm570_vm0, %v476_v38  ;;  %v318_v39 = vpop.f32.mrb[27].mxu0  ;;  %v478_v40 = vpop.f32.mrb[27].mxu1 }
 0x15f   :  { %v321_v41 = vpop.f32.mrb[28].mxu0  ;;  %v481_v42 = vpop.f32.mrb[28].mxu1 }
 0x160   :  { %585 = vst.msk [vmem:[%s1165_s2 + $0x70] sm:$0xff] %vm570_vm0, %v321_v41  ;;  %617 = vst.msk [vmem:[%s1165_s2 + $0x170] sm:$0xff] %vm570_vm0, %v481_v42  ;;  %v323_v43 = vpop.f32.mrb[29].mxu0  ;;  %v483_v44 = vpop.f32.mrb[29].mxu1 }
 0x163   :  { %v326_v45 = vpop.f32.mrb[30].mxu0  ;;  %v486_v46 = vpop.f32.mrb[30].mxu1 }
 0x164   :  { %586 = vst.msk [vmem:[%s1165_s2 + $0x78] sm:$0xff] %vm570_vm0, %v326_v45  ;;  %618 = vst.msk [vmem:[%s1165_s2 + $0x178] sm:$0xff] %vm570_vm0, %v486_v46  ;;  %v328_v47 = vpop.f32.mrb[31].mxu0  ;;  %v488_v48 = vpop.f32.mrb[31].mxu1 }
 0x167   :  { %v331_v49 = vpop.f32.mrb[32].mxu0  ;;  %v491_v50 = vpop.f32.mrb[32].mxu1 }
 0x168   :  { %587 = vst.msk [vmem:[%s1165_s2 + $0x80] sm:$0xff] %vm570_vm0, %v331_v49  ;;  %619 = vst.msk [vmem:[%s1165_s2 + $0x180] sm:$0xff] %vm570_vm0, %v491_v50  ;;  %v333_v51 = vpop.f32.mrb[33].mxu0  ;;  %v493_v52 = vpop.f32.mrb[33].mxu1 }
 0x16b   :  { %v336_v53 = vpop.f32.mrb[34].mxu0  ;;  %v496_v54 = vpop.f32.mrb[34].mxu1 }
 0x16c   :  { %588 = vst.msk [vmem:[%s1165_s2 + $0x88] sm:$0xff] %vm570_vm0, %v336_v53  ;;  %620 = vst.msk [vmem:[%s1165_s2 + $0x188] sm:$0xff] %vm570_vm0, %v496_v54  ;;  %v338_v55 = vpop.f32.mrb[35].mxu0  ;;  %v498_v56 = vpop.f32.mrb[35].mxu1 }
 0x16f   :  { %v341_v57 = vpop.f32.mrb[36].mxu0  ;;  %v501_v58 = vpop.f32.mrb[36].mxu1 }
 0x170   :  { %589 = vst.msk [vmem:[%s1165_s2 + $0x90] sm:$0xff] %vm570_vm0, %v341_v57  ;;  %621 = vst.msk [vmem:[%s1165_s2 + $0x190] sm:$0xff] %vm570_vm0, %v501_v58  ;;  %v343_v59 = vpop.f32.mrb[37].mxu0  ;;  %v503_v60 = vpop.f32.mrb[37].mxu1 }
 0x173   :  { %v346_v61 = vpop.f32.mrb[38].mxu0  ;;  %v506_v62 = vpop.f32.mrb[38].mxu1 }
 0x174   :  { %590 = vst.msk [vmem:[%s1165_s2 + $0x98] sm:$0xff] %vm570_vm0, %v346_v61  ;;  %622 = vst.msk [vmem:[%s1165_s2 + $0x198] sm:$0xff] %vm570_vm0, %v506_v62  ;;  %v348_v63 = vpop.f32.mrb[39].mxu0  ;;  %v508_v0 = vpop.f32.mrb[39].mxu1 }
 0x177   :  { %v351_v1 = vpop.f32.mrb[40].mxu0  ;;  %v511_v2 = vpop.f32.mrb[40].mxu1 }
 0x178   :  { %591 = vst.msk [vmem:[%s1165_s2 + $0xa0] sm:$0xff] %vm570_vm0, %v351_v1  ;;  %623 = vst.msk [vmem:[%s1165_s2 + $0x1a0] sm:$0xff] %vm570_vm0, %v511_v2  ;;  %v353_v3 = vpop.f32.mrb[41].mxu0  ;;  %v513_v4 = vpop.f32.mrb[41].mxu1 }
 0x17b   :  { %v356_v5 = vpop.f32.mrb[42].mxu0  ;;  %v516_v6 = vpop.f32.mrb[42].mxu1 }
 0x17c   :  { %592 = vst.msk [vmem:[%s1165_s2 + $0xa8] sm:$0xff] %vm570_vm0, %v356_v5  ;;  %624 = vst.msk [vmem:[%s1165_s2 + $0x1a8] sm:$0xff] %vm570_vm0, %v516_v6  ;;  %v358_v7 = vpop.f32.mrb[43].mxu0  ;;  %v518_v8 = vpop.f32.mrb[43].mxu1 }
 0x17f   :  { %v361_v9 = vpop.f32.mrb[44].mxu0  ;;  %v521_v10 = vpop.f32.mrb[44].mxu1 }
 0x180   :  { %593 = vst.msk [vmem:[%s1165_s2 + $0xb0] sm:$0xff] %vm570_vm0, %v361_v9  ;;  %625 = vst.msk [vmem:[%s1165_s2 + $0x1b0] sm:$0xff] %vm570_vm0, %v521_v10  ;;  %v363_v11 = vpop.f32.mrb[45].mxu0  ;;  %v523_v12 = vpop.f32.mrb[45].mxu1 }
 0x183   :  { %v366_v13 = vpop.f32.mrb[46].mxu0  ;;  %v526_v14 = vpop.f32.mrb[46].mxu1 }
 0x184   :  { %594 = vst.msk [vmem:[%s1165_s2 + $0xb8] sm:$0xff] %vm570_vm0, %v366_v13  ;;  %626 = vst.msk [vmem:[%s1165_s2 + $0x1b8] sm:$0xff] %vm570_vm0, %v526_v14  ;;  %v368_v15 = vpop.f32.mrb[47].mxu0  ;;  %v528_v16 = vpop.f32.mrb[47].mxu1 }
 0x187   :  { %v371_v17 = vpop.f32.mrb[48].mxu0  ;;  %v531_v18 = vpop.f32.mrb[48].mxu1 }
 0x188   :  { %595 = vst.msk [vmem:[%s1165_s2 + $0xc0] sm:$0xff] %vm570_vm0, %v371_v17  ;;  %627 = vst.msk [vmem:[%s1165_s2 + $0x1c0] sm:$0xff] %vm570_vm0, %v531_v18  ;;  %v373_v19 = vpop.f32.mrb[49].mxu0  ;;  %v533_v20 = vpop.f32.mrb[49].mxu1 }
 0x18b   :  { %v376_v21 = vpop.f32.mrb[50].mxu0  ;;  %v536_v22 = vpop.f32.mrb[50].mxu1 }
 0x18c   :  { %596 = vst.msk [vmem:[%s1165_s2 + $0xc8] sm:$0xff] %vm570_vm0, %v376_v21  ;;  %628 = vst.msk [vmem:[%s1165_s2 + $0x1c8] sm:$0xff] %vm570_vm0, %v536_v22  ;;  %v378_v23 = vpop.f32.mrb[51].mxu0  ;;  %v538_v24 = vpop.f32.mrb[51].mxu1 }
 0x18f   :  { %v381_v25 = vpop.f32.mrb[52].mxu0  ;;  %v541_v26 = vpop.f32.mrb[52].mxu1 }
 0x190   :  { %597 = vst.msk [vmem:[%s1165_s2 + $0xd0] sm:$0xff] %vm570_vm0, %v381_v25  ;;  %629 = vst.msk [vmem:[%s1165_s2 + $0x1d0] sm:$0xff] %vm570_vm0, %v541_v26  ;;  %v383_v27 = vpop.f32.mrb[53].mxu0  ;;  %v543_v28 = vpop.f32.mrb[53].mxu1 }
 0x193   :  { %v386_v29 = vpop.f32.mrb[54].mxu0  ;;  %v546_v30 = vpop.f32.mrb[54].mxu1 }
 0x194   :  { %598 = vst.msk [vmem:[%s1165_s2 + $0xd8] sm:$0xff] %vm570_vm0, %v386_v29  ;;  %630 = vst.msk [vmem:[%s1165_s2 + $0x1d8] sm:$0xff] %vm570_vm0, %v546_v30  ;;  %v388_v31 = vpop.f32.mrb[55].mxu0  ;;  %v548_v32 = vpop.f32.mrb[55].mxu1 }
 0x197   :  { %v391_v33 = vpop.f32.mrb[56].mxu0  ;;  %v551_v34 = vpop.f32.mrb[56].mxu1 }
 0x198   :  { %599 = vst.msk [vmem:[%s1165_s2 + $0xe0] sm:$0xff] %vm570_vm0, %v391_v33  ;;  %631 = vst.msk [vmem:[%s1165_s2 + $0x1e0] sm:$0xff] %vm570_vm0, %v551_v34  ;;  %v393_v35 = vpop.f32.mrb[57].mxu0  ;;  %v553_v36 = vpop.f32.mrb[57].mxu1 }
 0x19b   :  { %v396_v37 = vpop.f32.mrb[58].mxu0  ;;  %v556_v38 = vpop.f32.mrb[58].mxu1 }
 0x19c   :  { %600 = vst.msk [vmem:[%s1165_s2 + $0xe8] sm:$0xff] %vm570_vm0, %v396_v37  ;;  %632 = vst.msk [vmem:[%s1165_s2 + $0x1e8] sm:$0xff] %vm570_vm0, %v556_v38  ;;  %v398_v39 = vpop.f32.mrb[59].mxu0  ;;  %v558_v40 = vpop.f32.mrb[59].mxu1 }
 0x19f   :  { %v401_v41 = vpop.f32.mrb[60].mxu0  ;;  %v561_v42 = vpop.f32.mrb[60].mxu1 }
 0x1a0   :  { %601 = vst.msk [vmem:[%s1165_s2 + $0xf0] sm:$0xff] %vm570_vm0, %v401_v41  ;;  %633 = vst.msk [vmem:[%s1165_s2 + $0x1f0] sm:$0xff] %vm570_vm0, %v561_v42  ;;  %v403_v43 = vpop.f32.mrb[61].mxu0  ;;  %v563_v44 = vpop.f32.mrb[61].mxu1 }
 0x1a3   :  { %v406_v45 = vpop.f32.mrb[62].mxu0  ;;  %v566_v46 = vpop.f32.mrb[62].mxu1 }
 0x1a4   :  { %602 = vst.msk [vmem:[%s1165_s2 + $0xf8] sm:$0xff] %vm570_vm0, %v406_v45  ;;  %634 = vst.msk [vmem:[%s1165_s2 + $0x1f8] sm:$0xff] %vm570_vm0, %v566_v46  ;;  %v408_v47 = vpop.f32.mrb[63].mxu0  ;;  %v568_v48 = vpop.f32.mrb[63].mxu1 }
 0x1a5   :  { %639 = vsyncpa [#allocation3], 1 }

</bundles_post_ra>
